<compile_context>
chip_gen: v6e
topology: v6e:2x2x1
jax: 0.10.0
libtpu: 0.0.40
codegen_flags: <defaults>
</compile_context>

<pallas_src>
import math

import jax
import jax.numpy as jnp
from jax.experimental import pallas as pl
from jax.experimental.pallas import tpu as pltpu


def _round_up(x, m):
    return ((x + m - 1) // m) * m


def _gelu(h, exact):
    if exact:
        # exact erf form -- matches PyTorch nn.GELU() default
        return 0.5 * h * (1.0 + jax.lax.erf(h * (1.0 / math.sqrt(2.0))))
    # tanh approximation: the transcendental goes to the EUP (separate slot)
    c = math.sqrt(2.0 / math.pi)
    return 0.5 * h * (1.0 + jnp.tanh(c * (h + 0.044715 * (h * h * h))))


def _make_fast_kernel(compute_dtype, exact_gelu):
    """num_h == 1: full hidden dim resident, no accumulator."""
    def kernel(x_ref, w1_ref, b1_ref, w2_ref, b2_ref, o_ref):
        xb = x_ref[...].astype(compute_dtype)          # cast on VPU, in-kernel
        h = jnp.dot(xb, w1_ref[...], preferred_element_type=jnp.float32)
        h = _gelu(h + b1_ref[...], exact_gelu)
        y = jnp.dot(h.astype(compute_dtype), w2_ref[...],
                    preferred_element_type=jnp.float32)
        o_ref[...] = (y + b2_ref[...]).astype(o_ref.dtype)
    return kernel


def _make_chunked_kernel(compute_dtype, exact_gelu):
    """num_h > 1: H chunked with an f32 VMEM accumulator (reduction axis last)."""
    def kernel(x_ref, w1_ref, b1_ref, w2_ref, b2_ref, o_ref, acc_ref):
        k = pl.program_id(1)

        @pl.when(k == 0)
        def _():
            acc_ref[...] = jnp.zeros_like(acc_ref)

        xb = x_ref[...].astype(compute_dtype)
        h = jnp.dot(xb, w1_ref[...], preferred_element_type=jnp.float32)
        h = _gelu(h + b1_ref[...], exact_gelu)
        acc_ref[...] += jnp.dot(h.astype(compute_dtype), w2_ref[...],
                                preferred_element_type=jnp.float32)

        @pl.when(k == pl.num_programs(1) - 1)
        def _():
            o_ref[...] = (acc_ref[...] + b2_ref[...]).astype(o_ref.dtype)
    return kernel


def _vmem_budget_bytes():
    # Conservative default = v7x per-TC VMEM; query the real chip when possible.
    phys = 64 * 1024 * 1024
    try:
        info = pltpu.get_tpu_info()
        phys = int(getattr(info, "vmem_capacity_bytes", phys))
    except Exception:
        pass
    # Leave headroom for Mosaic internal scratch / pipelining.
    return max(32 * 1024 * 1024, phys - 16 * 1024 * 1024)


def _vmem_estimate(tm, C, th, o_pad, x_isz, w_isz, o_isz, c_isz, num_m, num_h):
    xbuf = 1 if num_m == 1 else 2
    wbuf = 1 if num_h == 1 else 2
    obuf = 1 if (num_m == 1 and num_h == 1) else 2
    return (xbuf * tm * C * x_isz                      # x tiles (original dtype)
            + wbuf * (C * th + th * o_pad) * w_isz     # w1 / w2 tiles
            + wbuf * th * 4 + o_pad * 4                # b1 / b2 (f32)
            + obuf * tm * o_pad * o_isz                # output tiles
            + tm * o_pad * 4                           # f32 accumulator / y temp
            + tm * th * 4                              # f32 hidden intermediate
            + tm * C * c_isz)                          # in-kernel casted x copy


def mlp_pallas(x, w1, b1, w2, b2, *, tm=256, th=None,
               compute_dtype=jnp.bfloat16, exact_gelu=False):
    """Swin `Mlp` forward.  x: (..., C); w1: (C, H), b1: (H,), w2: (H, O), b2: (O,).
    Returns (..., O) in x.dtype.  Dropout p=0.0 -> identity."""
    *lead, C = x.shape
    H = w1.shape[1]
    O = w2.shape[1]
    out_dtype = x.dtype
    M = int(math.prod(lead)) if lead else 1

    cdt = jnp.dtype(compute_dtype)
    x_isz = jnp.dtype(x.dtype).itemsize
    o_isz = jnp.dtype(out_dtype).itemsize
    w_isz = cdt.itemsize
    c_isz = cdt.itemsize

    # Lane-dense output: pad O up to a multiple of 128 so fc2 writebacks are
    # unmasked full-lane stores and the MXU columns are filled (O=96/192 etc.).
    O_pad = _round_up(O, 128)

    budget = _vmem_budget_bytes()
    fit = int(budget * 0.85)

    def est(tm_, th_, nm_, nh_):
        return _vmem_estimate(tm_, C, th_, O_pad, x_isz, w_isz, o_isz, c_isz,
                              nm_, nh_)

    # ---- token-tile / hidden-chunk selection --------------------------------
    tm_eff = min(_round_up(tm, 16), _round_up(M, 16))
    th_eff, num_h = H, 1

    forced_chunk = (th is not None and 0 < th < H
                    and H % th == 0 and th % 128 == 0)
    if forced_chunk:
        th_eff, num_h = th, H // th
    elif est(tm_eff, H, pl.cdiv(M, tm_eff), 1) <= fit:
        # Full hidden dim resident: weights DMA'd exactly once per call.
        # Grow the token tile while the working set still fits (amortises the
        # ~0.35us per-grid-step overhead; free on v5e/v6e's 128 MiB VMEM).
        while tm_eff < 512 and tm_eff < _round_up(M, 16):
            tm_try = min(512, tm_eff * 2, _round_up(M, 16))
            if tm_try == tm_eff:
                break
            if est(tm_try, H, pl.cdiv(M, tm_try), 1) <= fit:
                tm_eff = tm_try
            else:
                break
    else:
        # Weights do not fit VMEM: chunk H, but grow tm first so the weight
        # re-stream count (num_m) is as small as possible.
        tm_eff = min(512, _round_up(M, 16))
        if H % 128 == 0:
            for cand in range(H - 128, 127, -128):
                if H % cand == 0 and est(tm_eff, cand, pl.cdiv(M, tm_eff),
                                         H // cand) <= fit:
                    th_eff, num_h = cand, H // cand
                    break
            else:
                th_eff, num_h = 128, H // 128   # last-resort smallest chunk
        # else: H not a lane multiple -> keep th_eff = H (no chunking)

    M_pad = _round_up(M, tm_eff)
    num_m = M_pad // tm_eff

    # ---- operand preparation (activations stay in their dtype) --------------
    x2 = x.reshape(M, C)
    if M_pad != M:
        x2 = jnp.pad(x2, ((0, M_pad - M), (0, 0)))
    # TODO(synk): in a real model keep parameters resident in compute_dtype
    # (bf16) so these one-time casts/pads disappear entirely.
    w1c = w1.astype(compute_dtype)
    w2c = w2.astype(compute_dtype)
    b1_2 = b1.reshape(1, H).astype(jnp.float32)
    b2_2 = b2.reshape(1, O).astype(jnp.float32)
    if O_pad != O:
        w2c = jnp.pad(w2c, ((0, 0), (0, O_pad - O)))
        b2_2 = jnp.pad(b2_2, ((0, 0), (0, O_pad - O)))

    est_final = est(tm_eff, th_eff, num_m, num_h)
    vmem_limit = int(min(budget, max(32 * 1024 * 1024, int(est_final * 1.5))))

    def spec(shape, index_map, constant):
        # Grid-constant blocks never change -> single buffer (half the VMEM,
        # fetched from HBM exactly once).
        if constant:
            return pl.BlockSpec(shape, index_map, pipeline_mode=pl.Buffered(1))
        return pl.BlockSpec(shape, index_map)

    if num_h == 1:
        grid = (num_m,)
        in_specs = [
            spec((tm_eff, C), lambda i: (i, 0), constant=(num_m == 1)),   # x
            spec((C, H),      lambda i: (0, 0), constant=True),           # w1
            spec((1, H),      lambda i: (0, 0), constant=True),           # b1
            spec((H, O_pad),  lambda i: (0, 0), constant=True),           # w2
            spec((1, O_pad),  lambda i: (0, 0), constant=True),           # b2
        ]
        out_spec = pl.BlockSpec((tm_eff, O_pad), lambda i: (i, 0))
        kernel = _make_fast_kernel(compute_dtype, exact_gelu)
        scratch = []
        # TODO(synk): on v7x verify the M axis is actually sharded across both
        # TensorCores (xprof); switch to pltpu.CORE_PARALLEL if it is not.
        dims = ("parallel",)
    else:
        grid = (num_m, num_h)                     # reduction (H) axis last
        in_specs = [
            spec((tm_eff, C),     lambda i, k: (i, 0), constant=(num_m == 1)),
            spec((C, th_eff),     lambda i, k: (0, k), constant=False),
            spec((1, th_eff),     lambda i, k: (0, k), constant=False),
            spec((th_eff, O_pad), lambda i, k: (k, 0), constant=False),
            spec((1, O_pad),      lambda i, k: (0, 0), constant=True),
        ]
        out_spec = pl.BlockSpec((tm_eff, O_pad), lambda i, k: (i, 0))
        kernel = _make_chunked_kernel(compute_dtype, exact_gelu)
        scratch = [pltpu.VMEM((tm_eff, O_pad), jnp.float32)]
        dims = ("parallel", "arbitrary")

    out = pl.pallas_call(
        kernel,
        out_shape=jax.ShapeDtypeStruct((M_pad, O_pad), out_dtype),
        grid_spec=pltpu.PrefetchScalarGridSpec(
            num_scalar_prefetch=0,
            grid=grid,
            in_specs=in_specs,
            out_specs=out_spec,
            scratch_shapes=scratch,
        ),
        compiler_params=pltpu.CompilerParams(
            dimension_semantics=dims,
            vmem_limit_bytes=vmem_limit,
        ),
    )(x2, w1c, b1_2, w2c, b2_2)

    if M_pad != M or O_pad != O:
        out = out[:M, :O]
    return out.reshape(*lead, O)


if __name__ == "__main__":
    # Small shapes consistent with a Swin MLP block: hidden = 4 * in_features,
    # out_features defaults to in_features.
    B, N, C = 2, 64, 64
    H = 4 * C            # 256
    O = C                # 64 (padded to 128 lanes inside the wrapper)

    key = jax.random.PRNGKey(0)
    kx, kw1, kb1, kw2, kb2 = jax.random.split(key, 5)

    x = jax.random.normal(kx, (B, N, C), dtype=jnp.float32)
    bound1 = 1.0 / math.sqrt(C)
    w1 = jax.random.uniform(kw1, (C, H), minval=-bound1, maxval=bound1,
                            dtype=jnp.float32)
    b1 = jax.random.uniform(kb1, (H,), minval=-bound1, maxval=bound1,
                            dtype=jnp.float32)
    bound2 = 1.0 / math.sqrt(H)
    w2 = jax.random.uniform(kw2, (H, O), minval=-bound2, maxval=bound2,
                            dtype=jnp.float32)
    b2 = jax.random.uniform(kb2, (O,), minval=-bound2, maxval=bound2,
                            dtype=jnp.float32)

    def ref_mlp(xx, cast_dtype, exact):
        xm = xx.reshape(-1, C).astype(cast_dtype)
        h = jnp.dot(xm, w1.astype(cast_dtype),
                    preferred_element_type=jnp.float32) + b1
        if exact:
            h = 0.5 * h * (1.0 + jax.lax.erf(h / math.sqrt(2.0)))
        else:
            c = math.sqrt(2.0 / math.pi)
            h = 0.5 * h * (1.0 + jnp.tanh(c * (h + 0.044715 * h ** 3)))
        y = jnp.dot(h.astype(cast_dtype), w2.astype(cast_dtype),
                    preferred_element_type=jnp.float32) + b2
        return y.reshape(B, N, O).astype(xx.dtype)

    # 1) default fast path: full-H resident, bf16 MXU inputs, tanh GELU,
    #    lane-padded output.
    y1 = jax.block_until_ready(mlp_pallas(x, w1, b1, w2, b2))
    r1 = ref_mlp(x, jnp.bfloat16, exact=False)
    assert jnp.allclose(y1, r1, atol=2e-2, rtol=2e-2), \
        "fast path mismatch vs reference"

    # 2) forced chunked path (tm=48 -> M padded 128->144; th=128 -> 2 H chunks
    #    through the accumulator) with f32 compute and exact erf GELU for
    #    bit-level parity with nn.GELU().
    y2 = jax.block_until_ready(
        mlp_pallas(x, w1, b1, w2, b2, tm=48, th=128,
                   compute_dtype=jnp.float32, exact_gelu=True))
    r2 = ref_mlp(x, jnp.float32, exact=True)
    assert jnp.allclose(y2, r2, atol=1e-4, rtol=1e-4), \
        "chunked path mismatch vs reference"

    print("KERNEL_OK")
</pallas_src>

<mosaic_0001>
module attributes {stable_mosaic.version = 11 : i64} {
  func.func @kernel(%arg0: i32, %arg1: memref<128x64xf32, #tpu.memory_space<vmem>>, %arg2: memref<64x256xbf16, #tpu.memory_space<vmem>>, %arg3: memref<1x256xf32, #tpu.memory_space<vmem>>, %arg4: memref<256x128xbf16, #tpu.memory_space<vmem>>, %arg5: memref<1x128xf32, #tpu.memory_space<vmem>>, %arg6: memref<128x128xf32, #tpu.memory_space<vmem>>) attributes {dimension_semantics = [#tpu.dimension_semantics<parallel>], iteration_bounds = array<i64: 1>, scalar_prefetch = 0 : i64, scratch_operands = 0 : i64, tpu.core_type = #tpu.core_type<tc>, window_params = [{pipeline_mode = #tpu.pipeline_mode<synchronous>, transform_indices = @transform_0, window_bounds = array<i64: 128, 64>}, {pipeline_mode = #tpu.pipeline_mode<synchronous>, transform_indices = @transform_1, window_bounds = array<i64: 64, 256>}, {pipeline_mode = #tpu.pipeline_mode<synchronous>, transform_indices = @transform_2, window_bounds = array<i64: 1, 256>}, {pipeline_mode = #tpu.pipeline_mode<synchronous>, transform_indices = @transform_3, window_bounds = array<i64: 256, 128>}, {pipeline_mode = #tpu.pipeline_mode<synchronous>, transform_indices = @transform_4, window_bounds = array<i64: 1, 128>}, {transform_indices = @transform_5, window_bounds = array<i64: 128, 128>}]} {
    %c0 = arith.constant 0 : index
    %c0_0 = arith.constant 0 : index
    %0 = vector.load %arg1[%c0, %c0_0] : memref<128x64xf32, #tpu.memory_space<vmem>>, vector<128x64xf32>
    %1 = arith.truncf %0 : vector<128x64xf32> to vector<128x64xbf16>
    %c0_1 = arith.constant 0 : index
    %c0_2 = arith.constant 0 : index
    %2 = vector.load %arg2[%c0_1, %c0_2] : memref<64x256xbf16, #tpu.memory_space<vmem>>, vector<64x256xbf16>
    %cst = arith.constant dense<0.000000e+00> : vector<128x256xf32>
    %3 = tpu.matmul %1, %2, %cst {dimension_numbers = #tpu.dot_dimension_numbers<[1], [0], [0], [1], [0, 0, 1, 1], [], []>} : vector<128x64xbf16>, vector<64x256xbf16>, vector<128x256xf32> -> vector<128x256xf32>
    %c0_3 = arith.constant 0 : index
    %c0_4 = arith.constant 0 : index
    %4 = vector.load %arg3[%c0_3, %c0_4] : memref<1x256xf32, #tpu.memory_space<vmem>>, vector<1x256xf32>
    %5 = vector.broadcast %4 : vector<1x256xf32> to vector<128x256xf32>
    %6 = arith.addf %3, %5 : vector<128x256xf32>
    %cst_5 = arith.constant 5.000000e-01 : f32
    %7 = vector.broadcast %cst_5 : f32 to vector<128x256xf32>
    %8 = arith.mulf %7, %6 : vector<128x256xf32>
    %9 = arith.mulf %6, %6 : vector<128x256xf32>
    %10 = arith.mulf %9, %6 : vector<128x256xf32>
    %cst_6 = arith.constant 4.471500e-02 : f32
    %11 = vector.broadcast %cst_6 : f32 to vector<128x256xf32>
    %12 = arith.mulf %11, %10 : vector<128x256xf32>
    %13 = arith.addf %6, %12 : vector<128x256xf32>
    %cst_7 = arith.constant 0.797884583 : f32
    %14 = vector.broadcast %cst_7 : f32 to vector<128x256xf32>
    %15 = arith.mulf %14, %13 : vector<128x256xf32>
    %16 = math.tanh %15 : vector<128x256xf32>
    %cst_8 = arith.constant 1.000000e+00 : f32
    %17 = vector.broadcast %cst_8 : f32 to vector<128x256xf32>
    %18 = arith.addf %17, %16 : vector<128x256xf32>
    %19 = arith.mulf %8, %18 : vector<128x256xf32>
    %20 = arith.truncf %19 : vector<128x256xf32> to vector<128x256xbf16>
    %c0_9 = arith.constant 0 : index
    %c0_10 = arith.constant 0 : index
    %21 = vector.load %arg4[%c0_9, %c0_10] : memref<256x128xbf16, #tpu.memory_space<vmem>>, vector<256x128xbf16>
    %cst_11 = arith.constant dense<0.000000e+00> : vector<128x128xf32>
    %22 = tpu.matmul %20, %21, %cst_11 {dimension_numbers = #tpu.dot_dimension_numbers<[1], [0], [0], [1], [0, 0, 1, 1], [], []>} : vector<128x256xbf16>, vector<256x128xbf16>, vector<128x128xf32> -> vector<128x128xf32>
    %c0_12 = arith.constant 0 : index
    %c0_13 = arith.constant 0 : index
    %23 = vector.load %arg5[%c0_12, %c0_13] : memref<1x128xf32, #tpu.memory_space<vmem>>, vector<1x128xf32>
    %24 = vector.broadcast %23 : vector<1x128xf32> to vector<128x128xf32>
    %25 = arith.addf %22, %24 : vector<128x128xf32>
    %c0_14 = arith.constant 0 : index
    %c0_15 = arith.constant 0 : index
    %26 = vector.load %arg6[%c0_14, %c0_15] : memref<128x128xf32, #tpu.memory_space<vmem>>, vector<128x128xf32>
    tpu.vector_store %arg6[%c0_14, %c0_15], %25 {strides = array<i32>} : memref<128x128xf32, #tpu.memory_space<vmem>>, vector<128x128xf32>,
    return
  }
  func.func @transform_0(%arg0: i32) -> (i32, i32) {
    %c0_i32 = arith.constant 0 : i32
    %c0_i32_0 = arith.constant 0 : i32
    return %arg0, %c0_i32 : i32, i32
  }
  func.func @transform_1(%arg0: i32) -> (i32, i32) {
    %c0_i32 = arith.constant 0 : i32
    %c0_i32_0 = arith.constant 0 : i32
    %c0_i32_1 = arith.constant 0 : i32
    return %c0_i32, %c0_i32_0 : i32, i32
  }
  func.func @transform_2(%arg0: i32) -> (i32, i32) {
    %c0_i32 = arith.constant 0 : i32
    %c0_i32_0 = arith.constant 0 : i32
    %c0_i32_1 = arith.constant 0 : i32
    return %c0_i32, %c0_i32_0 : i32, i32
  }
  func.func @transform_3(%arg0: i32) -> (i32, i32) {
    %c0_i32 = arith.constant 0 : i32
    %c0_i32_0 = arith.constant 0 : i32
    %c0_i32_1 = arith.constant 0 : i32
    return %c0_i32, %c0_i32_0 : i32, i32
  }
  func.func @transform_4(%arg0: i32) -> (i32, i32) {
    %c0_i32 = arith.constant 0 : i32
    %c0_i32_0 = arith.constant 0 : i32
    %c0_i32_1 = arith.constant 0 : i32
    return %c0_i32, %c0_i32_0 : i32, i32
  }
  func.func @transform_5(%arg0: i32) -> (i32, i32) {
    %c0_i32 = arith.constant 0 : i32
    %c0_i32_0 = arith.constant 0 : i32
    return %arg0, %c0_i32 : i32, i32
  }
}

</mosaic_0001>

<bundles_post_ra>
// kernel: tpu_custom_call.1
= control target key start
LH: loop header
LB: loop body
LE: loop exit
PB: predicated region body
PF: predicated region fallthrough
CT: control target
= control target key end

     0   :  { %v1043_v2 = vmov 0   ;;  %vm106_vm0 = vcmask 523264   ;;  %s1478_s0 = inlined_call_operand.vmem [shape: f32[128,64], index: 0, kind: input, shape index: {}]   ;;  %s1479_s1 = inlined_call_operand.vmem [shape: bf16[64,256], index: 1, kind: input, shape index: {}]   ;;  %s1480_s2 = inlined_call_operand.vmem [shape: f32[1,256], index: 2, kind: input, shape index: {}]   ;;  %s1481_s3 = inlined_call_operand.vmem [shape: bf16[256,128], index: 3, kind: input, shape index: {}]   ;;  %s1482_s4 = inlined_call_operand.vmem [shape: f32[1,128], index: 4, kind: input, shape index: {}]   ;;  %s1483_s5 = inlined_call_operand.hbm [shape: f32[128,128], index: 5, kind: output, shape index: {}]  }
   0x1   :  { %v929_v0 = vld [vmem:[%s1479_s1 + $0x34] ss:$8 sps:$4 sm:$0xff]   ;;  %v931_v1 = vld [vmem:[%s1479_s1 + $0x30] ss:$8 sps:$4 sm:$0xff]   ;;  %163 = vmatprep.mubr.bf16.mxu0 %v1043_v2  ;;  %v932_v3 = vld [vmem:[%s1479_s1 + $0x24] ss:$8 sps:$4 sm:$0xff]  }
   0x2   :  { %139 = vmatprep.subr.bf16.mxu0 %v929_v0  ;;  %v934_v4 = vld [vmem:[%s1479_s1 + $0x20] ss:$8 sps:$4 sm:$0xff]   ;;  %v935_v5 = vld [vmem:[%s1479_s1 + $0x14] ss:$8 sps:$4 sm:$0xff]   ;;  %v937_v6 = vld [vmem:[%s1479_s1 + $0x10] ss:$8 sps:$4 sm:$0xff]  }
   0x3   :  { %140 = vmatpush1.bf16.msra.mxu0 %v931_v1  ;;  %v938_v7 = vld [vmem:[%s1479_s1 + $0x4] ss:$8 sps:$4 sm:$0xff]   ;;  %v940_v8 = vld [vmem:[%s1479_s1] ss:$8 sps:$4 sm:$0xff]   ;;  %v24_v12 = vld [vmem:[%s1478_s0 + $0x10] sm:$0xff] }
   0x4   :  { %141 = vmatprep.subr.bf16.mxu0 %v932_v3  ;;  %v22_v9 = vld [vmem:[%s1478_s0] sm:$0xff]  ;;  %v23_v10 = vld [vmem:[%s1478_s0 + $0x8] sm:$0xff]  ;;  %v25_v13 = vld [vmem:[%s1478_s0 + $0x18] sm:$0xff] }
   0x5   :  { %v38_v11 = vpack.c.bf16 %v23_v10, %v22_v9 }
   0x7   :  { %142 = vmatpush1.bf16.msra.mxu0 %v934_v4 }
   0x8   :  { %143 = vmatprep.subr.bf16.mxu0 %v935_v5 }
   0xb   :  { %144 = vmatpush1.bf16.msra.mxu0 %v937_v6 }
   0xc   :  { %145 = vmatprep.subr.bf16.mxu0 %v938_v7 }
   0xf   :  { %146 = vmatpush1.bf16.msra.mxu0 %v940_v8 }
  0x12   :  { %820 = vmatmul.mubr.msk.bf16.vlgmr.msra.gmra.mxu0 %vm106_vm0, %v38_v11 }
  0x13   :  { %173 = vmatprep.mubr.bf16.mxu0 %v1043_v2 }
  0x14   :  { %10 = vsyncpa [#allocation3], 0  ;;  %v39_v14 = vpack.c.bf16 %v25_v13, %v24_v12  ;;  %v26_v15 = vld [vmem:[%s1478_s0 + $0x20] sm:$0xff]  ;;  %v27_v16 = vld [vmem:[%s1478_s0 + $0x28] sm:$0xff]  ;;  %v56_v49 = vlaneseq }
  0x15   :  { %v40_v17 = vpack.c.bf16 %v27_v16, %v26_v15  ;;  %v28_v18 = vld [vmem:[%s1478_s0 + $0x30] sm:$0xff]  ;;  %v29_v19 = vld [vmem:[%s1478_s0 + $0x38] sm:$0xff]  ;;  %v30_v21 = vld [vmem:[%s1478_s0 + $0x40] sm:$0xff] }
  0x16   :  { %v41_v20 = vpack.c.bf16 %v29_v19, %v28_v18  ;;  %v31_v22 = vld [vmem:[%s1478_s0 + $0x48] sm:$0xff]  ;;  %v32_v24 = vld [vmem:[%s1478_s0 + $0x50] sm:$0xff]  ;;  %v33_v25 = vld [vmem:[%s1478_s0 + $0x58] sm:$0xff]  ;;  %v57_v50 = vshrl.u32 %v56_v49, 7 }
  0x17   :  { %v42_v23 = vpack.c.bf16 %v31_v22, %v30_v21  ;;  %v43_v26 = vpack.c.bf16 %v33_v25, %v32_v24  ;;  %v34_v27 = vld [vmem:[%s1478_s0 + $0x60] sm:$0xff]  ;;  %v35_v28 = vld [vmem:[%s1478_s0 + $0x68] sm:$0xff]  ;;  %v36_v30 = vld [vmem:[%s1478_s0 + $0x70] sm:$0xff] }
  0x18   :  { %v44_v29 = vpack.c.bf16 %v35_v28, %v34_v27  ;;  %v37_v31 = vld [vmem:[%s1478_s0 + $0x78] sm:$0xff]  ;;  %v943_v35 = vld [vmem:[%s1481_s3 + $0x70] sm:$0xff]   ;;  %v945_v37 = vld [vmem:[%s1481_s3 + $0x68] sm:$0xff]   ;;  %v58_v51 = vsub.s32 0, %v57_v50  ;;  %v62_v53 = vsub.s32 1, %v57_v50 }
  0x19   :  { %v45_v32 = vpack.c.bf16 %v37_v31, %v36_v30  ;;  %v941_v33 = vld [vmem:[%s1481_s3 + $0x78] sm:$0xff]   ;;  %v944_v36 = vld [vmem:[%s1481_s3 + $0x30] sm:$0xff]   ;;  %v946_v38 = vld [vmem:[%s1481_s3 + $0x28] sm:$0xff]  }
  0x1a   :  { %821 = vmatmul.mubr.msk.bf16.gmra.mxu0 %vm106_vm0, %v39_v14  ;;  %v942_v34 = vld [vmem:[%s1481_s3 + $0x38] sm:$0xff]   ;;  %845 = vmatprep.subr.bf16.mxu0 %v941_v33  ;;  %v947_v39 = vld [vmem:[%s1481_s3 + $0x60] sm:$0xff]   ;;  %v951_v43 = vld [vmem:[%s1481_s3 + $0x50] sm:$0xff]  }
  0x1b   :  { %183 = vmatprep.mubr.bf16.mxu0 %v1043_v2  ;;  %909 = vmatprep.subr.bf16.mxu1 %v941_v33  ;;  %v948_v40 = vld [vmem:[%s1481_s3 + $0x20] sm:$0xff]   ;;  %v949_v41 = vld [vmem:[%s1481_s3 + $0x58] sm:$0xff]   ;;  %v952_v44 = vld [vmem:[%s1481_s3 + $0x10] sm:$0xff]  }
  0x1c   :  { %846 = vmatpush3.bf16.msra.mxu0 %v942_v34  ;;  %917 = vmatpush3.bf16.msra.mxu1 %v942_v34  ;;  %v950_v42 = vld [vmem:[%s1481_s3 + $0x18] sm:$0xff]   ;;  %v953_v45 = vld [vmem:[%s1481_s3 + $0x48] sm:$0xff]   ;;  %v955_v47 = vld [vmem:[%s1481_s3 + $0x40] sm:$0xff]  }
  0x1d   :  { %847 = vmatprep.subr.bf16.mxu0 %v943_v35  ;;  %910 = vmatprep.subr.bf16.mxu1 %v943_v35  ;;  %v954_v46 = vld [vmem:[%s1481_s3 + $0x8] sm:$0xff]   ;;  %v956_v48 = vld [vmem:[%s1481_s3] sm:$0xff]  }
  0x1e   :  { %v54_v52 = vld [vmem:[%s1480_s2] sm:$0x3] }
  0x1f   :  { %v1208_v54 = vrot.slane %v54_v52, %v58_v51  ;;  %v1210_v55 = vrot.slane %v54_v52, %v62_v53 }
  0x20   :  { %848 = vmatpush3.bf16.msra.mxu0 %v944_v36  ;;  %918 = vmatpush3.bf16.msra.mxu1 %v944_v36 }
  0x21   :  { %849 = vmatprep.subr.bf16.mxu0 %v945_v37  ;;  %911 = vmatprep.subr.bf16.mxu1 %v945_v37 }
  0x22   :  { %822 = vmatmul.mubr.msk.bf16.gmra.mxu0 %vm106_vm0, %v40_v17 }
  0x23   :  { %193 = vmatprep.mubr.bf16.mxu0 %v1043_v2 }
  0x24   :  { %850 = vmatpush3.bf16.msra.mxu0 %v946_v38  ;;  %919 = vmatpush3.bf16.msra.mxu1 %v946_v38 }
  0x25   :  { %851 = vmatprep.subr.bf16.mxu0 %v947_v39  ;;  %912 = vmatprep.subr.bf16.mxu1 %v947_v39 }
  0x28   :  { %852 = vmatpush3.bf16.msra.mxu0 %v948_v40  ;;  %920 = vmatpush3.bf16.msra.mxu1 %v948_v40 }
  0x29   :  { %853 = vmatprep.subr.bf16.mxu0 %v949_v41  ;;  %913 = vmatprep.subr.bf16.mxu1 %v949_v41 }
  0x2a   :  { %823 = vmatmul.mubr.msk.bf16.gmra.mxu0 %vm106_vm0, %v41_v20 }
  0x2b   :  { %203 = vmatprep.mubr.bf16.mxu0 %v1043_v2 }
  0x2c   :  { %854 = vmatpush3.bf16.msra.mxu0 %v950_v42  ;;  %921 = vmatpush3.bf16.msra.mxu1 %v950_v42 }
  0x2d   :  { %855 = vmatprep.subr.bf16.mxu0 %v951_v43  ;;  %914 = vmatprep.subr.bf16.mxu1 %v951_v43 }
  0x30   :  { %856 = vmatpush3.bf16.msra.mxu0 %v952_v44  ;;  %922 = vmatpush3.bf16.msra.mxu1 %v952_v44 }
  0x31   :  { %857 = vmatprep.subr.bf16.mxu0 %v953_v45  ;;  %915 = vmatprep.subr.bf16.mxu1 %v953_v45 }
  0x32   :  { %824 = vmatmul.mubr.msk.bf16.gmra.mxu0 %vm106_vm0, %v42_v23 }
  0x33   :  { %213 = vmatprep.mubr.bf16.mxu0 %v1043_v2 }
  0x34   :  { %858 = vmatpush3.bf16.msra.mxu0 %v954_v46  ;;  %923 = vmatpush3.bf16.msra.mxu1 %v954_v46 }
  0x35   :  { %859 = vmatprep.subr.bf16.mxu0 %v955_v47  ;;  %916 = vmatprep.subr.bf16.mxu1 %v955_v47 }
  0x38   :  { %860 = vmatpush3.bf16.msra.mxu0 %v956_v48  ;;  %924 = vmatpush3.bf16.msra.mxu1 %v956_v48 }
  0x3a   :  { %825 = vmatmul.mubr.msk.bf16.gmra.mxu0 %vm106_vm0, %v43_v26 }
  0x3b   :  { %223 = vmatprep.mubr.bf16.mxu0 %v1043_v2 }
  0x42   :  { %826 = vmatmul.mubr.msk.bf16.gmra.mxu0 %vm106_vm0, %v44_v29 }
  0x43   :  { %233 = vmatprep.mubr.bf16.mxu0 %v1043_v2 }
  0x4a   :  { %827 = vmatmul.mubr.msk.bf16.gmra.mxu0 %vm106_vm0, %v45_v32 }
  0xd2   :  { %v165_v56 = vpop.f32.mrf.mxu0 }
  0xd3   :  { %v166_v57 = vadd.f32 %v165_v56, %v1208_v54 }
  0xd4   :  { %v167_v58 = vpop.f32.mrf.mxu0 }
  0xd5   :  { %v276_v59 = vmul.f32 %v166_v57, %v166_v57  ;;  %v168_v60 = vadd.f32 %v167_v58, %v1210_v55  ;;  %v1217_v16 = vmul.f32 0.5, %v166_v57 }
  0xd6   :  { %v169_v61 = vpop.f32.mrf.mxu0 }
  0xd7   :  { %v308_v62 = vmul.f32 %v276_v59, %v166_v57  ;;  %v277_v63 = vmul.f32 %v168_v60, %v168_v60  ;;  %v170_v0 = vadd.f32 %v169_v61, %v1208_v54  ;;  %v1220_v23 = vmul.f32 0.5, %v168_v60 }
  0xd8   :  { %v171_v1 = vpop.f32.mrf.mxu0 }
  0xd9   :  { %v340_v2 = vmul.f32 0.044715, %v308_v62  ;;  %v309_v3 = vmul.f32 %v277_v63, %v168_v60  ;;  %v278_v4 = vmul.f32 %v170_v0, %v170_v0  ;;  %v172_v5 = vadd.f32 %v171_v1, %v1210_v55 }
  0xda   :  { %v175_v6 = vpop.f32.mrf.mxu0  ;;  %v1222_v24 = vmul.f32 0.5, %v170_v0 }
  0xdb   :  { %v372_v7 = vadd.f32 %v340_v2, %v166_v57  ;;  %v341_v8 = vmul.f32 0.044715, %v309_v3  ;;  %v310_v9 = vmul.f32 %v278_v4, %v170_v0  ;;  %v176_v10 = vadd.f32 %v175_v6, %v1208_v54 }
  0xdc   :  { %v279_v11 = vmul.f32 %v172_v5, %v172_v5  ;;  %v177_v12 = vpop.f32.mrf.mxu0  ;;  %v1226_v32 = vmul.f32 0.5, %v172_v5 }
  0xdd   :  { %v404_v13 = vmul.f32 0.7978846, %v372_v7  ;;  %v342_v14 = vmul.f32 0.044715, %v310_v9  ;;  %v280_v15 = vmul.f32 %v176_v10, %v176_v10  ;;  %v373_v17 = vadd.f32 %v341_v8, %v168_v60 }
  0xde   :  { %v311_v18 = vmul.f32 %v279_v11, %v172_v5  ;;  %v178_v19 = vadd.f32 %v177_v12, %v1210_v55  ;;  %v179_v20 = vpop.f32.mrf.mxu0  ;;  %v1229_v45 = vmul.f32 0.5, %v176_v10 }
  0xdf   :  { %957 = vtanh.f32 %v404_v13  ;;  %v374_v21 = vadd.f32 %v342_v14, %v170_v0  ;;  %v312_v22 = vmul.f32 %v280_v15, %v176_v10  ;;  %v180_v27 = vadd.f32 %v179_v20, %v1208_v54 }
  0xe0   :  { %v343_v25 = vmul.f32 0.044715, %v311_v18  ;;  %v281_v26 = vmul.f32 %v178_v19, %v178_v19  ;;  %v181_v28 = vpop.f32.mrf.mxu0  ;;  %v405_v33 = vmul.f32 0.7978846, %v373_v17  ;;  %v1232_v49 = vmul.f32 0.5, %v178_v19 }
  0xe1   :  { %v406_v29 = vmul.f32 0.7978846, %v374_v21  ;;  %v344_v30 = vmul.f32 0.044715, %v312_v22  ;;  %v182_v31 = vadd.f32 %v181_v28, %v1210_v55  ;;  %v282_v36 = vmul.f32 %v180_v27, %v180_v27 }
  0xe2   :  { %v375_v34 = vadd.f32 %v343_v25, %v172_v5  ;;  %v313_v35 = vmul.f32 %v281_v26, %v178_v19  ;;  %v185_v37 = vpop.f32.mrf.mxu0  ;;  %v1234_v59 = vmul.f32 0.5, %v180_v27 }
  0xe3   :  { %959 = vtanh.f32 %v406_v29  ;;  %v376_v38 = vadd.f32 %v344_v30, %v176_v10  ;;  %v283_v39 = vmul.f32 %v182_v31, %v182_v31  ;;  %v186_v40 = vadd.f32 %v185_v37, %v1208_v54 }
  0xe4   :  { %v407_v41 = vmul.f32 0.7978846, %v375_v34  ;;  %v345_v42 = vmul.f32 0.044715, %v313_v35  ;;  %v314_v43 = vmul.f32 %v282_v36, %v180_v27  ;;  %v187_v44 = vpop.f32.mrf.mxu0  ;;  %961 = vtanh.f32 %v405_v33 }
  0xe5   :  { %v315_v46 = vmul.f32 %v283_v39, %v182_v31  ;;  %v284_v47 = vmul.f32 %v186_v40, %v186_v40  ;;  %v188_v48 = vadd.f32 %v187_v44, %v1210_v55  ;;  %v408_v50 = vmul.f32 0.7978846, %v376_v38 }
  0xe6   :  { %v346_v51 = vmul.f32 0.044715, %v314_v43  ;;  %v189_v52 = vpop.f32.mrf.mxu0  ;;  %v377_v53 = vadd.f32 %v345_v42, %v178_v19  ;;  %963 = vtanh.f32 %v407_v41  ;;  %v1240_v7 = vmul.f32 0.5, %v182_v31 }
  0xe7   :  { %v347_v56 = vmul.f32 0.044715, %v315_v46  ;;  %v316_v57 = vmul.f32 %v284_v47, %v186_v40  ;;  %v285_v58 = vmul.f32 %v188_v48, %v188_v48  ;;  %v190_v61 = vadd.f32 %v189_v52, %v1208_v54 }
  0xe8   :  { %v378_v60 = vadd.f32 %v346_v51, %v180_v27  ;;  %v191_v62 = vpop.f32.mrf.mxu0  ;;  %v409_v63 = vmul.f32 0.7978846, %v377_v53  ;;  %965 = vtanh.f32 %v408_v50  ;;  %v1247_v15 = vmul.f32 0.5, %v188_v48 }
  0xe9   :  { %v348_v0 = vmul.f32 0.044715, %v316_v57  ;;  %v317_v1 = vmul.f32 %v285_v58, %v188_v48  ;;  %v1238_v2 = vadd.f32 %v191_v62, %v1210_v55  ;;  %v379_v3 = vadd.f32 %v347_v56, %v182_v31 }
  0xea   :  { %v410_v4 = vmul.f32 0.7978846, %v378_v60  ;;  %v286_v5 = vmul.f32 %v190_v61, %v190_v61  ;;  %v195_v6 = vpop.f32.mrf.mxu0  ;;  %967 = vtanh.f32 %v409_v63  ;;  %v1249_v17 = vmul.f32 0.5, %v186_v40 }
  0xeb   :  { %v380_v8 = vadd.f32 %v348_v0, %v186_v40  ;;  %v349_v9 = vmul.f32 0.044715, %v317_v1  ;;  %v287_v10 = vmul.f32 %v1238_v2, %v1238_v2  ;;  %v1245_v11 = vadd.f32 %v195_v6, %v1208_v54 }
  0xec   :  { %v958_v12 = vpop.eup %957  ;;  %v318_v13 = vmul.f32 %v286_v5, %v190_v61  ;;  %v197_v14 = vpop.f32.mrf.mxu0  ;;  %v411_v21 = vmul.f32 0.7978846, %v379_v3  ;;  %v1257_v28 = vmul.f32 0.5, %v190_v61  ;;  %969 = vtanh.f32 %v410_v4 }
  0xed   :  { %v468_v18 = vadd.f32 1.0, %v958_v12  ;;  %v381_v19 = vadd.f32 %v349_v9, %v188_v48  ;;  %v319_v20 = vmul.f32 %v287_v10, %v1238_v2  ;;  %v288_v25 = vmul.f32 %v1245_v11, %v1245_v11 }
  0xee   :  { %v350_v22 = vmul.f32 0.044715, %v318_v13  ;;  %v1255_v26 = vadd.f32 %v197_v14, %v1210_v55  ;;  %v199_v27 = vpop.f32.mrf.mxu0  ;;  %v412_v29 = vmul.f32 0.7978846, %v380_v8  ;;  %971 = vtanh.f32 %v411_v21 }
  0xef   :  { %v413_v30 = vmul.f32 0.7978846, %v381_v19  ;;  %v351_v31 = vmul.f32 0.044715, %v319_v20  ;;  %v320_v35 = vmul.f32 %v288_v25, %v1245_v11  ;;  %v1263_v37 = vadd.f32 %v199_v27, %v1208_v54 }
  0xf0   :  { %v960_v33 = vpop.eup %959  ;;  %v382_v34 = vadd.f32 %v350_v22, %v190_v61  ;;  %v289_v36 = vmul.f32 %v1255_v26, %v1255_v26  ;;  %v201_v38 = vpop.f32.mrf.mxu0  ;;  %v1266_v39 = vmul.f32 %v468_v18, %v1217_v16  ;;  %973 = vtanh.f32 %v412_v29 }
  0xf1   :  { %v383_v40 = vadd.f32 %v351_v31, %v1238_v2  ;;  %v1270_v41 = vadd.f32 %v201_v38, %v1210_v55  ;;  %v352_v43 = vmul.f32 0.044715, %v320_v35  ;;  %v290_v46 = vmul.f32 %v1263_v37, %v1263_v37  ;;  %v962_v48 = vpop.eup %961 }
  0xf2   :  { %v414_v42 = vmul.f32 0.7978846, %v382_v34  ;;  %v321_v44 = vmul.f32 %v289_v36, %v1255_v26  ;;  %v205_v47 = vpop.f32.mrf.mxu0  ;;  %v470_v50 = vadd.f32 1.0, %v960_v33  ;;  %975 = vtanh.f32 %v413_v30 }
  0xf3   :  { %v291_v16 = vmul.f32 %v1270_v41, %v1270_v41  ;;  %v1278_v51 = vadd.f32 %v205_v47, %v1208_v54  ;;  %v384_v52 = vadd.f32 %v352_v43, %v1245_v11  ;;  %v322_v56 = vmul.f32 %v290_v46, %v1263_v37  ;;  %v964_v58 = vpop.eup %963 }
  0xf4   :  { %v353_v53 = vmul.f32 0.044715, %v321_v44  ;;  %v207_v57 = vpop.f32.mrf.mxu0  ;;  %v415_v60 = vmul.f32 0.7978846, %v383_v40  ;;  %977 = vtanh.f32 %v414_v42  ;;  %v469_v18 = vadd.f32 1.0, %v962_v48 }
  0xf5   :  { %v323_v61 = vmul.f32 %v291_v16, %v1270_v41  ;;  %v292_v62 = vmul.f32 %v1278_v51, %v1278_v51  ;;  %v1286_v63 = vadd.f32 %v207_v57, %v1210_v55  ;;  %v416_v0 = vmul.f32 0.7978846, %v384_v52  ;;  %v1289_v5 = vpop.eup %965 }
  0xf6   :  { %v385_v1 = vadd.f32 %v353_v53, %v1255_v26  ;;  %v354_v3 = vmul.f32 0.044715, %v322_v56  ;;  %v209_v4 = vpop.f32.mrf.mxu0  ;;  %v471_v19 = vadd.f32 1.0, %v964_v58  ;;  %v502_v29 = vmul.f32 %v470_v50, %v1222_v24 }
  0xf7   :  { %v355_v6 = vmul.f32 0.044715, %v323_v61  ;;  %v324_v8 = vmul.f32 %v292_v62, %v1278_v51  ;;  %v293_v9 = vmul.f32 %v1286_v63, %v1286_v63  ;;  %v1295_v10 = vadd.f32 %v209_v4, %v1208_v54  ;;  %v968_v20 = vpop.eup %967 }
  0xf8   :  { %v417_v12 = vmul.f32 0.7978846, %v385_v1  ;;  %v386_v13 = vadd.f32 %v354_v3, %v1263_v37  ;;  %v211_v14 = vpop.f32.mrf.mxu0  ;;  %979 = vtanh.f32 %v415_v60  ;;  %v501_v42 = vmul.f32 %v469_v18, %v1220_v23 }
  0xf9   :  { %v387_v21 = vadd.f32 %v355_v6, %v1270_v41  ;;  %v356_v22 = vmul.f32 0.044715, %v324_v8  ;;  %v325_v25 = vmul.f32 %v293_v9, %v1286_v63  ;;  %v294_v27 = vmul.f32 %v1295_v10, %v1295_v10  ;;  %v970_v38 = vpop.eup %969 }
  0xfa   :  { %v418_v30 = vmul.f32 0.7978846, %v386_v13  ;;  %v1304_v31 = vadd.f32 %v211_v14, %v1210_v55  ;;  %v215_v33 = vpop.f32.mrf.mxu0  ;;  %981 = vtanh.f32 %v416_v0  ;;  %v503_v24 = vmul.f32 %v471_v19, %v1226_v32 }
  0xfb   :  { %v388_v34 = vadd.f32 %v356_v22, %v1278_v51  ;;  %v357_v35 = vmul.f32 0.044715, %v325_v25  ;;  %v326_v36 = vmul.f32 %v294_v27, %v1295_v10  ;;  %v1313_v43 = vadd.f32 %v215_v33, %v1208_v54  ;;  %v972_v50 = vpop.eup %971 }
  0xfc   :  { %v295_v40 = vmul.f32 %v1304_v31, %v1304_v31  ;;  %v217_v44 = vpop.f32.mrf.mxu0  ;;  %983 = vtanh.f32 %v417_v12  ;;  %v419_v46 = vmul.f32 0.7978846, %v387_v21  ;;  %v533_v52 = vpack.c.bf16 %v503_v24, %v501_v42 }
  0xfd   :  { %v389_v47 = vadd.f32 %v357_v35, %v1286_v63  ;;  %v358_v48 = vmul.f32 0.044715, %v326_v36  ;;  %985 = vtanh.f32 %v418_v30  ;;  %v296_v53 = vmul.f32 %v1313_v43, %v1313_v43  ;;  %v1324_v60 = vpop.eup %973 }
  0xfe   :  { %v327_v16 = vmul.f32 %v295_v40, %v1304_v31  ;;  %v219_v23 = vpop.f32.mrf.mxu0  ;;  %v420_v56 = vmul.f32 0.7978846, %v388_v34  ;;  %v532_v57 = vpack.c.bf16 %v502_v29, %v1266_v39  ;;  %v1322_v58 = vadd.f32 %v217_v44, %v1210_v55  ;;  %715 = vmatprep.mubr.bf16.mxu0 %v533_v52 }
  0xff   :  { %v390_v32 = vadd.f32 %v358_v48, %v1295_v10  ;;  %v328_v62 = vmul.f32 %v296_v53, %v1313_v43  ;;  %v1328_v0 = vadd.f32 %v219_v23, %v1208_v54  ;;  %v473_v3 = vadd.f32 1.0, %v968_v20  ;;  %v1330_v4 = vpop.eup %975 }
 0x100   :  { %v359_v61 = vmul.f32 0.044715, %v327_v16  ;;  %v221_v1 = vpop.f32.mrf.mxu0  ;;  %987 = vtanh.f32 %v419_v46  ;;  %v421_v6 = vmul.f32 0.7978846, %v389_v47  ;;  %716 = vmatmul.mubr.bf16.vlgmr.msra.gmra.mxu0 %v532_v57  ;;  %v297_v39 = vmul.f32 %v1322_v58, %v1322_v58 }
 0x101   :  { %v1335_v8 = vadd.f32 %v221_v1, %v1210_v55  ;;  %v360_v12 = vmul.f32 0.044715, %v328_v62  ;;  %v298_v13 = vmul.f32 %v1328_v0, %v1328_v0  ;;  %v475_v14 = vadd.f32 1.0, %v972_v50  ;;  %v1340_v19 = vpop.eup %977 }
 0x102   :  { %v391_v9 = vadd.f32 %v359_v61, %v1304_v31  ;;  %v225_v18 = vpop.f32.mrf.mxu0  ;;  %989 = vtanh.f32 %v420_v56  ;;  %v422_v20 = vmul.f32 0.7978846, %v390_v32  ;;  %v329_v21 = vmul.f32 %v297_v39, %v1322_v58 }
 0x103   :  { %v299_v22 = vmul.f32 %v1335_v8, %v1335_v8  ;;  %v392_v25 = vadd.f32 %v360_v12, %v1313_v43  ;;  %v330_v27 = vmul.f32 %v298_v13, %v1328_v0  ;;  %v505_v29 = vmul.f32 %v473_v3, %v1232_v49 }
 0x104   :  { %v507_v30 = vmul.f32 %v475_v14, %v1240_v7  ;;  %v227_v33 = vpop.f32.mrf.mxu0  ;;  %v361_v34 = vmul.f32 0.044715, %v329_v21  ;;  %v1351_v36 = vadd.f32 %v225_v18, %v1208_v54  ;;  %v472_v40 = vadd.f32 1.0, %v1289_v5 }
 0x105   :  { %v331_v35 = vmul.f32 %v299_v22, %v1335_v8  ;;  %991 = vtanh.f32 %v421_v6  ;;  %v423_v42 = vmul.f32 0.7978846, %v391_v9  ;;  %v424_v24 = vmul.f32 0.7978846, %v392_v25  ;;  %v980_v47 = vpop.eup %979 }
 0x106   :  { %v535_v44 = vpack.c.bf16 %v507_v30, %v505_v29  ;;  %v229_v46 = vpop.f32.mrf.mxu0  ;;  %v362_v48 = vmul.f32 0.044715, %v330_v27  ;;  %v300_v49 = vmul.f32 %v1351_v36, %v1351_v36  ;;  %v474_v7 = vadd.f32 1.0, %v970_v38 }
 0x107   :  { %v363_v50 = vmul.f32 0.044715, %v331_v35  ;;  %v1356_v16 = vpop.eup %981  ;;  %993 = vtanh.f32 %v422_v20  ;;  %v393_v52 = vadd.f32 %v361_v34, %v1322_v58  ;;  %v1360_v5 = vadd.f32 %v227_v33, %v1210_v55 }
 0x108   :  { %723 = vmatprep.mubr.bf16.mxu1 %v535_v44  ;;  %v231_v53 = vpop.f32.mrf.mxu0  ;;  %v255_v23 = vmul.f32 0.5, %v1238_v2  ;;  %v332_v32 = vmul.f32 %v300_v49, %v1351_v36  ;;  %v504_v57 = vmul.f32 %v472_v40, %v1229_v45  ;;  %v506_v38 = vmul.f32 %v474_v7, %v1234_v59 }
 0x109   :  { %v395_v56 = vadd.f32 %v363_v50, %v1335_v8  ;;  %v1367_v61 = vpop.eup %983  ;;  %995 = vtanh.f32 %v423_v42  ;;  %v301_v62 = vmul.f32 %v1360_v5, %v1360_v5  ;;  %v1372_v1 = vadd.f32 %v229_v46, %v1208_v54 }
 0x10a   :  { %v1375_v3 = vadd.f32 %v231_v53, %v1210_v55  ;;  %v235_v2 = vpop.f32.mrf.mxu0  ;;  %v1377_v6 = vpop.eup %985  ;;  %997 = vtanh.f32 %v424_v24  ;;  %v394_v45 = vadd.f32 %v362_v48, %v1328_v0  ;;  %v364_v39 = vmul.f32 0.044715, %v332_v32 }
 0x10b   :  { %v534_v59 = vpack.c.bf16 %v506_v38, %v504_v57  ;;  %v425_v9 = vmul.f32 0.7978846, %v393_v52  ;;  %v333_v12 = vmul.f32 %v301_v62, %v1360_v5  ;;  %v302_v13 = vmul.f32 %v1372_v1, %v1372_v1 }
 0x10c   :  { %v303_v14 = vmul.f32 %v1375_v3, %v1375_v3  ;;  %v237_v18 = vpop.f32.mrf.mxu0  ;;  %v427_v20 = vmul.f32 0.7978846, %v395_v56  ;;  %v396_v21 = vadd.f32 %v364_v39, %v1351_v36  ;;  %v477_v22 = vadd.f32 1.0, %v1330_v4 }
 0x10d   :  { %724 = vmatmul.mubr.bf16.vlgmr.msra.gmra.mxu1 %v534_v59  ;;  %v479_v25 = vadd.f32 1.0, %v980_v47  ;;  %v988_v27 = vpop.eup %987  ;;  %v365_v29 = vmul.f32 0.044715, %v333_v12  ;;  %v334_v30 = vmul.f32 %v302_v13, %v1372_v1  ;;  %v1390_v34 = vadd.f32 %v235_v2, %v1208_v54 }
 0x10e   :  { %v335_v33 = vmul.f32 %v303_v14, %v1375_v3  ;;  %v239_v35 = vpop.f32.mrf.mxu0  ;;  %v426_v40 = vmul.f32 0.7978846, %v394_v45  ;;  %v509_v42 = vmul.f32 %v477_v22, %v1247_v15  ;;  %v476_v44 = vadd.f32 1.0, %v1324_v60 }
 0x10f   :  { %v511_v24 = vmul.f32 %v479_v25, %v255_v23  ;;  %v1394_v46 = vpop.eup %989  ;;  %999 = vtanh.f32 %v425_v9  ;;  %v397_v4 = vadd.f32 %v365_v29, %v1360_v5  ;;  %v366_v47 = vmul.f32 0.044715, %v334_v30 }
 0x110   :  { %v367_v48 = vmul.f32 0.044715, %v335_v33  ;;  %v241_v50 = vpop.f32.mrf.mxu0  ;;  %1001 = vtanh.f32 %v427_v20  ;;  %v428_v49 = vmul.f32 0.7978846, %v396_v21  ;;  %v478_v52 = vadd.f32 1.0, %v1340_v19 }
 0x111   :  { %v537_v7 = vpack.c.bf16 %v511_v24, %v509_v42  ;;  %v398_v53 = vadd.f32 %v366_v47, %v1372_v1  ;;  %v304_v60 = vmul.f32 %v1390_v34, %v1390_v34  ;;  %v508_v23 = vmul.f32 %v476_v44, %v1249_v17 }
 0x112   :  { %v399_v15 = vadd.f32 %v367_v48, %v1375_v3  ;;  %v992_v56 = vpop.eup %991  ;;  %v510_v32 = vmul.f32 %v478_v52, %v1257_v28  ;;  %v1405_v57 = vadd.f32 %v237_v18, %v1210_v55  ;;  %v1408_v38 = vadd.f32 %v239_v35, %v1208_v54 }
 0x113   :  { %731 = vmatprep.mubr.bf16.mxu1 %v537_v7  ;;  %v1411_v19 = vadd.f32 %v241_v50, %v1210_v55  ;;  %1003 = vtanh.f32 %v426_v40  ;;  %v429_v62 = vmul.f32 0.7978846, %v397_v4  ;;  %v430_v54 = vmul.f32 0.7978846, %v398_v53 }
 0x114   :  { %v431_v2 = vmul.f32 0.7978846, %v399_v15  ;;  %v994_v45 = vpop.eup %993  ;;  %v536_v39 = vpack.c.bf16 %v510_v32, %v508_v23  ;;  %v305_v17 = vmul.f32 %v1405_v57, %v1405_v57  ;;  %v306_v28 = vmul.f32 %v1408_v38, %v1408_v38 }
 0x115   :  { %v307_v59 = vmul.f32 %v1411_v19, %v1411_v19  ;;  %1005 = vtanh.f32 %v428_v49  ;;  %v336_v9 = vmul.f32 %v304_v60, %v1390_v34  ;;  %v257_v20 = vmul.f32 0.5, %v1255_v26 }
 0x116   :  { %v996_v55 = vpop.eup %995  ;;  %1007 = vtanh.f32 %v431_v2  ;;  %732 = vmatmul.mubr.bf16.gmra.mxu1 %v536_v39  ;;  %v337_v12 = vmul.f32 %v305_v17, %v1405_v57  ;;  %v338_v13 = vmul.f32 %v306_v28, %v1408_v38  ;;  %v259_v21 = vmul.f32 0.5, %v1270_v41 }
 0x117   :  { %v339_v14 = vmul.f32 %v307_v59, %v1411_v19  ;;  %v1423_v18 = vpop.eup %997  ;;  %v481_v22 = vadd.f32 1.0, %v1367_v61  ;;  %v483_v25 = vadd.f32 1.0, %v988_v27  ;;  %1009 = vtanh.f32 %v429_v62 }
 0x118   :  { %v369_v29 = vmul.f32 0.044715, %v337_v12  ;;  %1011 = vtanh.f32 %v430_v54  ;;  %v368_v33 = vmul.f32 0.044715, %v336_v9  ;;  %v370_v24 = vmul.f32 0.044715, %v338_v13 }
 0x119   :  { %v371_v30 = vmul.f32 0.044715, %v339_v14  ;;  %v513_v35 = vmul.f32 %v481_v22, %v257_v20  ;;  %v515_v40 = vmul.f32 %v483_v25, %v259_v21  ;;  %v480_v4 = vadd.f32 1.0, %v1356_v16 }
 0x11a   :  { %v401_v42 = vadd.f32 %v369_v29, %v1405_v57  ;;  %v256_v41 = vmul.f32 0.5, %v1245_v11  ;;  %v258_v61 = vmul.f32 0.5, %v1263_v37  ;;  %v482_v27 = vadd.f32 1.0, %v1377_v6 }
 0x11b   :  { %v403_v44 = vadd.f32 %v371_v30, %v1411_v19  ;;  %v539_v26 = vpack.c.bf16 %v515_v40, %v513_v35  ;;  %v261_v49 = vmul.f32 0.5, %v1286_v63  ;;  %v263_v7 = vmul.f32 0.5, %v1304_v31 }
 0x11c   :  { %v1000_v47 = vpop.eup %999  ;;  %v433_v48 = vmul.f32 0.7978846, %v401_v42  ;;  %v512_v53 = vmul.f32 %v480_v4, %v256_v41  ;;  %v514_v15 = vmul.f32 %v482_v27, %v258_v61  ;;  %v485_v60 = vadd.f32 1.0, %v992_v56 }
 0x11d   :  { %v435_v50 = vmul.f32 0.7978846, %v403_v44  ;;  %v1002_v52 = vpop.eup %1001  ;;  %739 = vmatprep.mubr.bf16.mxu1 %v539_v26  ;;  %v487_v16 = vadd.f32 1.0, %v996_v55  ;;  %v402_v11 = vadd.f32 %v370_v24, %v1408_v38  ;;  %v486_v6 = vadd.f32 1.0, %v994_v45 }
 0x11e   :  { %1013 = vtanh.f32 %v433_v48  ;;  %v538_v23 = vpack.c.bf16 %v514_v15, %v512_v53  ;;  %v517_v37 = vmul.f32 %v485_v60, %v261_v49  ;;  %v400_v2 = vadd.f32 %v368_v33, %v1390_v34 }
 0x11f   :  { %v519_v32 = vmul.f32 %v487_v16, %v263_v7  ;;  %1015 = vtanh.f32 %v435_v50  ;;  %v262_v63 = vmul.f32 0.5, %v1295_v10  ;;  %v484_v31 = vadd.f32 1.0, %v1394_v46 }
 0x120   :  { %v1004_v62 = vpop.eup %1003  ;;  %740 = vmatmul.mubr.bf16.gmra.mxu1 %v538_v23  ;;  %v267_v56 = vmul.f32 0.5, %v1335_v8  ;;  %v489_v17 = vadd.f32 1.0, %v1000_v47  ;;  %v491_v28 = vadd.f32 1.0, %v1002_v52  ;;  %v265_v54 = vmul.f32 0.5, %v1322_v58 }
 0x121   :  { %v541_v39 = vpack.c.bf16 %v519_v32, %v517_v37  ;;  %v434_v55 = vmul.f32 0.7978846, %v402_v11  ;;  %v260_v45 = vmul.f32 0.5, %v1278_v51  ;;  %v518_v12 = vmul.f32 %v486_v6, %v262_v63 }
 0x122   :  { %v1006_v59 = vpop.eup %1005  ;;  %v523_v13 = vmul.f32 %v491_v28, %v267_v56  ;;  %v521_v14 = vmul.f32 %v489_v17, %v265_v54  ;;  %v432_v20 = vmul.f32 0.7978846, %v400_v2  ;;  %v490_v29 = vadd.f32 1.0, %v1004_v62  ;;  %v1457_v62 = vld [vmem:[%s1482_s4] ss:$0 sm:$0xff]  ;;  %s1044_s4 = smov [#allocation2]  }
 0x123   :  { %v1008_v9 = vpop.eup %1007  ;;  %747 = vmatprep.mubr.bf16.mxu1 %v541_v39  ;;  %v516_v46 = vmul.f32 %v484_v31, %v260_v45  ;;  %1017 = vtanh.f32 %v434_v55  ;;  %v271_v30 = vmul.f32 0.5, %v1375_v3  ;;  %v266_v33 = vmul.f32 0.5, %v1328_v0  ;;  %s801_s20 = sshll.u32 %s1044_s4, 4  ;;  %s802_s20 = int_to_ptr.vmem [resolvable:$true] %s801_s20 }
 0x124   :  { %v1010_v10 = vpop.eup %1009  ;;  %v543_v22 = vpack.c.bf16 %v523_v13, %v521_v14  ;;  %v495_v25 = vadd.f32 1.0, %v1008_v9  ;;  %1019 = vtanh.f32 %v432_v20  ;;  %v488_v51 = vadd.f32 1.0, %v1423_v18  ;;  %s1021_s21 = scalar_lea.vmem %s802_s20, 2048  ;;  %p1026_p1 = scmp.lt.s32.totalorder %s802_s20, %s802_s20 }
 0x125   :  { %v1012_v21 = vpop.eup %1011  ;;  %v540_v8 = vpack.c.bf16 %v518_v12, %v516_v46  ;;  %v493_v58 = vadd.f32 1.0, %v1010_v10  ;;  %v269_v35 = vmul.f32 0.5, %v1360_v5  ;;  %v264_v24 = vmul.f32 0.5, %v1313_v43  ;;  %p1022_p0 = scmp.ne.s32.totalorder %s802_s20, %s1021_s21  ;;  %p1027_p2 = scmp.lt.s32.totalorder %s1021_s21, %s1021_s21 }
 0x126   :  { %v527_v40 = vmul.f32 %v495_v25, %v271_v30  ;;  %v522_v44 = vmul.f32 %v490_v29, %v266_v33  ;;  %v494_v47 = vadd.f32 1.0, %v1012_v21  ;;  %v275_v48 = vmul.f32 0.5, %v1411_v19 }
 0x127   :  { %v525_v4 = vmul.f32 %v493_v58, %v269_v35  ;;  %v520_v41 = vmul.f32 %v488_v51, %v264_v24  ;;  %v270_v18 = vmul.f32 0.5, %v1372_v1  ;;  %v492_v50 = vadd.f32 1.0, %v1006_v59  ;;  %p1028_p3 = por %p1027_p2, %p1026_p1 }
 0x128   :  { %748 = vmatmul.mubr.bf16.gmra.mxu1 %v540_v8  ;;  %v273_v5 = vmul.f32 0.5, %v1405_v57  ;;  %v268_v43 = vmul.f32 0.5, %v1351_v36  ;;  %v274_v19 = vmul.f32 0.5, %v1408_v38  ;;  %v272_v1 = vmul.f32 0.5, %v1390_v34 }
 0x129   :  { %755 = vmatprep.mubr.bf16.mxu1 %v543_v22  ;;  %v545_v61 = vpack.c.bf16 %v527_v40, %v525_v4  ;;  %v542_v27 = vpack.c.bf16 %v522_v44, %v520_v41  ;;  %v526_v7 = vmul.f32 %v494_v47, %v270_v18  ;;  %p1029_p4 = pnand %p1028_p3, %p1022_p0 }
 0x12a   :  { %v524_v15 = vmul.f32 %v492_v50, %v268_v43 }
 0x12b   :  { %v1014_v42 = vpop.eup %1013 }
 0x12c   :  { %v1016_v26 = vpop.eup %1015  ;;  %v497_v0 = vadd.f32 1.0, %v1014_v42  ;;  %v544_v11 = vpack.c.bf16 %v526_v7, %v524_v15 }
 0x12d   :  { %v499_v3 = vadd.f32 1.0, %v1016_v26 }
 0x12e   :  { %v529_v53 = vmul.f32 %v497_v0, %v273_v5 }
 0x12f   :  { %v531_v49 = vmul.f32 %v499_v3, %v275_v48 }
 0x130   :  { %756 = vmatmul.mubr.bf16.gmra.mxu1 %v542_v27  ;;  %v1018_v52 = vpop.eup %1017 }
 0x131   :  { %763 = vmatprep.mubr.bf16.mxu1 %v545_v61  ;;  %v1020_v60 = vpop.eup %1019  ;;  %v547_v16 = vpack.c.bf16 %v531_v49, %v529_v53  ;;  %v498_v23 = vadd.f32 1.0, %v1018_v52 }
 0x132   :  { %v496_v37 = vadd.f32 1.0, %v1020_v60 }
 0x133   :  { %v530_v32 = vmul.f32 %v498_v23, %v274_v19 }
 0x134   :  { %v528_v57 = vmul.f32 %v496_v37, %v272_v1 }
 0x136   :  { %v546_v6 = vpack.c.bf16 %v530_v32, %v528_v57 }
 0x138   :  { %764 = vmatmul.mubr.bf16.gmra.mxu1 %v544_v11 }
 0x139   :  { %771 = vmatprep.mubr.bf16.mxu1 %v547_v16 }
 0x140   :  { %772 = vmatmul.mubr.bf16.gmra.mxu1 %v546_v6 }
 0x1c0   :  { %v861_v36 = vpop.f32.mrf.mxu0 }
 0x1c2   :  { %v862_v2 = vpop.f32.mrf.mxu0 }
 0x1c3   :  { %v863_v63 = vadd.f32 %v862_v2, %v861_v36 }
 0x1c4   :  { %v864_v31 = vpop.f32.mrf.mxu0 }
 0x1c5   :  { %v718_v39 = vadd.f32 %v863_v63, %v1457_v62 }
 0x1c6   :  { %v865_v38 = vpop.f32.mrf.mxu0 }
 0x1c7   :  { %780 = vst [vmem:[#allocation2] sm:$0xff] %v718_v39  ;;  %v866_v56 = vadd.f32 %v865_v38, %v864_v31 }
 0x1c9   :  { %v721_v34 = vadd.f32 %v866_v56, %v1457_v62 }
 0x1cb   :  { %781 = vst [vmem:[#allocation2 + $0x8] sm:$0xff] %v721_v34 }
 0x1cd   :  { %v867_v17 = vpop.f32.mrf.mxu1 }
 0x1cf   :  { %v868_v28 = vpop.f32.mrf.mxu1 }
 0x1d0   :  { %v869_v59 = vadd.f32 %v868_v28, %v867_v17 }
 0x1d1   :  { %v870_v54 = vpop.f32.mrf.mxu1 }
 0x1d2   :  { %v726_v9 = vadd.f32 %v869_v59, %v1457_v62 }
 0x1d3   :  { %v871_v55 = vpop.f32.mrf.mxu1 }
 0x1d4   :  { %782 = vst [vmem:[#allocation2 + $0x10] sm:$0xff] %v726_v9  ;;  %v872_v45 = vadd.f32 %v871_v55, %v870_v54 }
 0x1d6   :  { %v729_v12 = vadd.f32 %v872_v45, %v1457_v62  ;;  %v873_v13 = vpop.f32.mrf.mxu1 }
 0x1d8   :  { %783 = vst [vmem:[#allocation2 + $0x18] sm:$0xff] %v729_v12  ;;  %v874_v14 = vpop.f32.mrf.mxu1 }
 0x1d9   :  { %v875_v10 = vadd.f32 %v874_v14, %v873_v13 }
 0x1da   :  { %v876_v20 = vpop.f32.mrf.mxu1 }
 0x1db   :  { %v734_v46 = vadd.f32 %v875_v10, %v1457_v62 }
 0x1dc   :  { %v877_v21 = vpop.f32.mrf.mxu1 }
 0x1dd   :  { %784 = vst [vmem:[#allocation2 + $0x20] sm:$0xff] %v734_v46  ;;  %v878_v22 = vadd.f32 %v877_v21, %v876_v20 }
 0x1df   :  { %v737_v25 = vadd.f32 %v878_v22, %v1457_v62 }
 0x1e0   :  { %v879_v8 = vpop.f32.mrf.mxu1 }
 0x1e1   :  { %785 = vst [vmem:[#allocation2 + $0x28] sm:$0xff] %v737_v25 }
 0x1e2   :  { %v880_v29 = vpop.f32.mrf.mxu1 }
 0x1e3   :  { %v881_v30 = vadd.f32 %v880_v29, %v879_v8 }
 0x1e4   :  { %v882_v58 = vpop.f32.mrf.mxu1 }
 0x1e5   :  { %v742_v33 = vadd.f32 %v881_v30, %v1457_v62 }
 0x1e6   :  { %v883_v51 = vpop.f32.mrf.mxu1 }
 0x1e7   :  { %786 = vst [vmem:[#allocation2 + $0x30] sm:$0xff] %v742_v33  ;;  %v884_v35 = vadd.f32 %v883_v51, %v882_v58 }
 0x1e8   :  { %v885_v40 = vpop.f32.mrf.mxu1 }
 0x1e9   :  { %v745_v42 = vadd.f32 %v884_v35, %v1457_v62 }
 0x1ea   :  { %v886_v24 = vpop.f32.mrf.mxu1 }
 0x1eb   :  { %787 = vst [vmem:[#allocation2 + $0x38] sm:$0xff] %v745_v42  ;;  %v887_v44 = vadd.f32 %v886_v24, %v885_v40 }
 0x1ec   :  { %v888_v4 = vpop.f32.mrf.mxu1 }
 0x1ed   :  { %v750_v26 = vadd.f32 %v887_v44, %v1457_v62 }
 0x1ee   :  { %v889_v41 = vpop.f32.mrf.mxu1 }
 0x1ef   :  { %788 = vst [vmem:[#allocation2 + $0x40] sm:$0xff] %v750_v26  ;;  %v890_v61 = vadd.f32 %v889_v41, %v888_v4 }
 0x1f0   :  { %v891_v3 = vpop.f32.mrf.mxu1 }
 0x1f1   :  { %v753_v27 = vadd.f32 %v890_v61, %v1457_v62 }
 0x1f2   :  { %v892_v47 = vpop.f32.mrf.mxu1 }
 0x1f3   :  { %789 = vst [vmem:[#allocation2 + $0x48] sm:$0xff] %v753_v27  ;;  %v893_v48 = vadd.f32 %v892_v47, %v891_v3 }
 0x1f4   :  { %v894_v0 = vpop.f32.mrf.mxu1 }
 0x1f5   :  { %v758_v18 = vadd.f32 %v893_v48, %v1457_v62 }
 0x1f6   :  { %v895_v50 = vpop.f32.mrf.mxu1 }
 0x1f7   :  { %790 = vst [vmem:[#allocation2 + $0x50] sm:$0xff] %v758_v18  ;;  %v896_v5 = vadd.f32 %v895_v50, %v894_v0 }
 0x1f8   :  { %v897_v49 = vpop.f32.mrf.mxu1 }
 0x1f9   :  { %v761_v43 = vadd.f32 %v896_v5, %v1457_v62 }
 0x1fa   :  { %v898_v7 = vpop.f32.mrf.mxu1 }
 0x1fb   :  { %791 = vst [vmem:[#allocation2 + $0x58] sm:$0xff] %v761_v43  ;;  %v899_v52 = vadd.f32 %v898_v7, %v897_v49 }
 0x1fc   :  { %v900_v53 = vpop.f32.mrf.mxu1 }
 0x1fd   :  { %v766_v15 = vadd.f32 %v899_v52, %v1457_v62 }
 0x1fe   :  { %v901_v60 = vpop.f32.mrf.mxu1 }
 0x1ff   :  { %792 = vst [vmem:[#allocation2 + $0x60] sm:$0xff] %v766_v15  ;;  %v902_v16 = vadd.f32 %v901_v60, %v900_v53 }
 0x200   :  { %v903_v11 = vpop.f32.mrf.mxu1 }
 0x201   :  { %v769_v23 = vadd.f32 %v902_v16, %v1457_v62 }
 0x202   :  { %v904_v19 = vpop.f32.mrf.mxu1 }
 0x203   :  { %793 = vst [vmem:[#allocation2 + $0x68] sm:$0xff] %v769_v23  ;;  %v905_v37 = vadd.f32 %v904_v19, %v903_v11 }
 0x204   :  { %v906_v1 = vpop.f32.mrf.mxu1 }
 0x205   :  { %v774_v32 = vadd.f32 %v905_v37, %v1457_v62 }
 0x206   :  { %v907_v57 = vpop.f32.mrf.mxu1 }
 0x207   :  { %794 = vst [vmem:[#allocation2 + $0x70] sm:$0xff] %v774_v32  ;;  %v908_v6 = vadd.f32 %v907_v57, %v906_v1 }
 0x209   :  { %v777_v36 = vadd.f32 %v908_v6, %v1457_v62 }
 0x20b   :  { %795 = vst [vmem:[#allocation2 + $0x78] sm:$0xff] %v777_v36 }
 0x20c   :  { %1032 = shalt.err (!%p1029_p4)
}
 0x20d   :  { %s1045_s22 = smov 128   ;;  %s1046_s23 = smov 8  }
 0x20e   :  { %807 = dma.vmem_to_hbm [thread:$0]  %s802_s20, 2048, %s1483_s5, [#allocation3], %s1045_s22, %s1045_s22, %s1046_s23  }
 0x20f   :  { %1041 = dma.done.wait [#allocation3], 2048  }
 0x210   :  { %1042 = vsyncadd [#allocation3], 4294965248 }
 0x211   :  { %811 = vsyncpa [#allocation3], 1 }

</bundles_post_ra>
